<compile_context>
chip_gen: v6e
topology: v6e:2x2x1
jax: 0.10.0
libtpu: 0.0.40
codegen_flags: <defaults>
</compile_context>

<pallas_src>
import functools
import math

import jax
import jax.numpy as jnp
from jax.experimental import pallas as pl
from jax.experimental.pallas import tpu as pltpu

_INV_SQRT2 = 1.0 / math.sqrt(2.0)
_SQRT_2_OVER_PI = math.sqrt(2.0 / math.pi)


# ---------------------------------------------------------------------------
# Kernels
# ---------------------------------------------------------------------------

def _gelu(h, exact):
    if exact:
        return 0.5 * h * (1.0 + jax.lax.erf(h * _INV_SQRT2))
    # tanh-approx GELU: goes to the EUP (separate VLIW slot), nearly free.
    inner = _SQRT_2_OVER_PI * (h + 0.044715 * (h * h * h))
    return 0.5 * h * (1.0 + jnp.tanh(inner))


def _mlp_kernel_resident(x_ref, w1_ref, b1_ref, w2_ref, b2_ref, o_ref, *,
                         exact_gelu):
    # Weights-resident path: w1/w2/b1/b2 have constant index_maps, so they are
    # DMA'd only once and stay in VMEM while row tiles stream through.
    h = jnp.dot(x_ref[...], w1_ref[...], preferred_element_type=jnp.float32)
    h = h + b1_ref[...].astype(jnp.float32)
    g = _gelu(h, exact_gelu)
    y = jnp.dot(g.astype(w2_ref.dtype), w2_ref[...],
                preferred_element_type=jnp.float32)
    o_ref[...] = (y + b2_ref[...].astype(jnp.float32)).astype(o_ref.dtype)


def _mlp_kernel_htiled(x_ref, w1_ref, b1_ref, w2_ref, b2_ref, o_ref, acc_ref,
                       *, exact_gelu):
    # H-tiled reduction path: per hidden tile compute
    #   acc += gelu(x @ w1[:, h] + b1[h]) @ w2[h, :]
    # into an f32 VMEM accumulator; finalize (bias + cast) once.
    h_idx = pl.program_id(1)

    h = jnp.dot(x_ref[...], w1_ref[...], preferred_element_type=jnp.float32)
    h = h + b1_ref[...].astype(jnp.float32)
    g = _gelu(h, exact_gelu)
    part = jnp.dot(g.astype(w2_ref.dtype), w2_ref[...],
                   preferred_element_type=jnp.float32)

    @pl.when(h_idx == 0)
    def _first():
        acc_ref[...] = part            # direct write: no zero-fill + RMW

    @pl.when(h_idx > 0)
    def _rest():
        acc_ref[...] += part

    @pl.when(h_idx == pl.num_programs(1) - 1)
    def _finalize():
        o_ref[...] = (acc_ref[...] + b2_ref[...].astype(jnp.float32)
                      ).astype(o_ref.dtype)


# ---------------------------------------------------------------------------
# Tile planning (generation-aware)
# ---------------------------------------------------------------------------

def _round_up(x, m):
    return ((x + m - 1) // m) * m


def _vmem_budget_bytes():
    """Generation-aware VMEM budget with headroom for Mosaic scratch."""
    cap = 64 * 1024 * 1024          # conservative fallback (= v7x per-TC VMEM)
    try:
        cap = int(pltpu.get_tpu_info().vmem_capacity_bytes)
    except Exception:
        pass
    return min(cap * 3 // 4, 100 * 1024 * 1024)


def _h_tile_candidates(H, target):
    """Multiples of 128 dividing H, descending from target; fallback [H]."""
    cands = []
    t = (min(target, H) // 128) * 128
    while t >= 128:
        if H % t == 0:
            cands.append(t)
        t -= 128
    return cands or [H]


def _resident_bytes(tm, C, H, isz_x, isz_w, isz_o):
    wb = 2 * 2 * C * H * isz_w      # w1 + w2 (conservative: 2 pipeline buffers)
    xb = 2 * tm * C * isz_x         # x row tile, double-buffered
    ob = 2 * tm * C * isz_o         # output row tile, double-buffered
    inter = 2 * tm * H * 4          # f32 intermediates (h, gelu(h))
    bias = 4 * (H + C) * 4
    return wb + xb + ob + inter + bias


def _htiled_bytes(tm, th, C, isz_x, isz_w, isz_o):
    wb = 2 * 2 * C * th * isz_w     # w1/w2 hidden tiles, double-buffered
    xb = 2 * tm * C * isz_x
    ob = 2 * tm * C * isz_o
    acc = tm * C * 4                # f32 accumulator scratch
    inter = 2 * tm * th * 4         # f32 intermediates for this hidden tile
    bias = 4 * (th + C) * 4
    return wb + xb + ob + acc + inter + bias


def _plan_tiles(M, C, H, isz_x, isz_w, isz_o, budget, tile_m, tile_h):
    """Returns (tm, th). th is None => weights-resident path (no H grid axis)."""
    min_sub = {4: 8, 2: 16, 1: 32}.get(isz_x, 8)

    tm_target = tile_m
    if M >= 4096:
        tm_target = max(tm_target, 1024)     # grow the row tile for large M
    tm_target = min(tm_target, _round_up(M, min_sub))
    tm_target = max(_round_up(tm_target, min_sub), min_sub)

    tm_candidates = []
    t = tm_target
    while True:
        tm_candidates.append(t)
        if t <= min_sub:
            break
        nxt = max(_round_up(t // 2, min_sub), min_sub)
        if nxt == t:
            break
        t = nxt

    # 1) Weights-resident fast path.
    for tm in tm_candidates:
        if tm < 256 and tm != tm_candidates[0]:
            break   # don't shrink rows below 256 just to force residency
        if _resident_bytes(tm, C, H, isz_x, isz_w, isz_o) <= budget:
            return tm, None

    # 2) H-tiled reduction path.
    for tm in tm_candidates:
        for th in _h_tile_candidates(H, tile_h):
            if _htiled_bytes(tm, th, C, isz_x, isz_w, isz_o) <= budget:
                return tm, th

    # Last resort (estimate is conservative; let Mosaic have a go).
    return tm_candidates[-1], _h_tile_candidates(H, 128)[-1]


# ---------------------------------------------------------------------------
# Wrapper
# ---------------------------------------------------------------------------

def mlp_forward(x, w1, b1, w2, b2, *, tile_m=512, tile_h=2048,
                exact_gelu=False, compute_dtype=None):
    """Fused GPT-MLP forward: c_proj(gelu(c_fc(x))).

    x: [B, T, C]; w1: [C, 4C]; b1: [4C]; w2: [4C, C]; b2: [C].
    Weights are stored pre-transposed to [in, out] layout.
    compute_dtype: optional operand cast (e.g. jnp.bfloat16 on v5e); the
    accumulation stays f32 and the output keeps x.dtype.
    """
    out_dtype = x.dtype
    B, T, C = x.shape
    H = w1.shape[1]
    M = B * T

    x2d = x.reshape(M, C)
    if compute_dtype is not None:
        x2d = x2d.astype(compute_dtype)
        w1 = w1.astype(compute_dtype)
        w2 = w2.astype(compute_dtype)

    isz_x = jnp.dtype(x2d.dtype).itemsize
    isz_w = jnp.dtype(w1.dtype).itemsize
    isz_o = jnp.dtype(out_dtype).itemsize
    min_sub = {4: 8, 2: 16, 1: 32}.get(isz_x, 8)

    budget = _vmem_budget_bytes()
    tm, th = _plan_tiles(M, C, H, isz_x, isz_w, isz_o, budget, tile_m, tile_h)

    # v7x megacore: ensure the "parallel" row axis has >= 2 blocks.
    M_pad = _round_up(M, tm)
    while M_pad // tm < 2 and tm > min_sub:
        tm = max(_round_up(tm // 2, min_sub), min_sub)
        M_pad = _round_up(M, tm)

    if M_pad != M:
        x2d = jnp.pad(x2d, ((0, M_pad - M), (0, 0)))
    b1_2d = b1.reshape(1, H)
    b2_2d = b2.reshape(1, C)

    if th is None:
        # ---- Weights-resident path: weights DMA'd once, stay in VMEM. ----
        grid = (M_pad // tm,)
        kernel = functools.partial(_mlp_kernel_resident, exact_gelu=exact_gelu)
        in_specs = [
            pl.BlockSpec((tm, C), lambda i: (i, 0)),    # x row tile
            pl.BlockSpec((C, H), lambda i: (0, 0)),     # w1 (resident)
            pl.BlockSpec((1, H), lambda i: (0, 0)),     # b1 (resident)
            pl.BlockSpec((H, C), lambda i: (0, 0)),     # w2 (resident)
            pl.BlockSpec((1, C), lambda i: (0, 0)),     # b2 (resident)
        ]
        out_specs = pl.BlockSpec((tm, C), lambda i: (i, 0))
        scratch_shapes = []
        dim_sem = ("parallel",)
        weight_fetches = 1
    else:
        # ---- H-tiled reduction path (weights streamed per row tile). ----
        # TODO(synk): if profiles show exposed weight DMA, sweep
        # pipeline_mode=pl.Buffered(3) on the w1/w2 BlockSpecs.
        grid = (M_pad // tm, H // th)
        kernel = functools.partial(_mlp_kernel_htiled, exact_gelu=exact_gelu)
        in_specs = [
            pl.BlockSpec((tm, C), lambda i, h: (i, 0)),   # x row tile
            pl.BlockSpec((C, th), lambda i, h: (0, h)),   # w1 hidden tile
            pl.BlockSpec((1, th), lambda i, h: (0, h)),   # b1 hidden tile
            pl.BlockSpec((th, C), lambda i, h: (h, 0)),   # w2 hidden tile
            pl.BlockSpec((1, C), lambda i, h: (0, 0)),    # b2 (finalize only)
        ]
        out_specs = pl.BlockSpec((tm, C), lambda i, h: (i, 0))
        scratch_shapes = [pltpu.VMEM((tm, C), jnp.float32)]
        dim_sem = ("parallel", "arbitrary")
        weight_fetches = M_pad // tm   # weights re-streamed once per row tile

    cost = pl.CostEstimate(
        flops=2 * 2 * M_pad * C * H,                 # two matmuls
        transcendentals=M_pad * H,                   # one tanh per hidden elem
        bytes_accessed=int(
            x2d.size * isz_x
            + (w1.size + w2.size) * isz_w * weight_fetches
            + (b1.size + b2.size) * jnp.dtype(b1.dtype).itemsize
            + M_pad * C * isz_o),
    )

    out2d = pl.pallas_call(
        kernel,
        out_shape=jax.ShapeDtypeStruct((M_pad, C), out_dtype),
        grid_spec=pltpu.PrefetchScalarGridSpec(
            num_scalar_prefetch=0,
            grid=grid,
            in_specs=in_specs,
            out_specs=out_specs,
            scratch_shapes=scratch_shapes,
        ),
        compiler_params=pltpu.CompilerParams(
            dimension_semantics=dim_sem,
            vmem_limit_bytes=int(budget),
        ),
        cost_estimate=cost,
    )(x2d, w1, b1_2d, w2, b2_2d)

    if M_pad != M:
        out2d = out2d[:M]
    return out2d.reshape(B, T, C)


# ---------------------------------------------------------------------------
# Params init (nn.Linear style) + self-test
# ---------------------------------------------------------------------------

def init_mlp_params(key, n_embd):
    """nn.Linear-style init (U(-1/sqrt(fan_in), +1/sqrt(fan_in))).

    Weights are stored pre-transposed to [in, out] layout for the kernel.
    """
    hidden = 4 * n_embd
    k1, k2, k3, k4 = jax.random.split(key, 4)

    bound_fc = 1.0 / math.sqrt(n_embd)
    w1 = jax.random.uniform(k1, (n_embd, hidden), jnp.float32,
                            -bound_fc, bound_fc)
    b1 = jax.random.uniform(k2, (hidden,), jnp.float32, -bound_fc, bound_fc)

    bound_proj = 1.0 / math.sqrt(hidden)
    w2 = jax.random.uniform(k3, (hidden, n_embd), jnp.float32,
                            -bound_proj, bound_proj)
    b2 = jax.random.uniform(k4, (n_embd,), jnp.float32, -bound_proj, bound_proj)
    return w1, b1, w2, b2


if __name__ == "__main__":
    # Small config consistent with the module: n_embd=32 -> hidden=128.
    B, T, C = 2, 8, 32

    key = jax.random.PRNGKey(0)
    kx, kp = jax.random.split(key)
    x = jax.random.normal(kx, (B, T, C), jnp.float32)
    w1, b1, w2, b2 = init_mlp_params(kp, C)

    out = mlp_forward(x, w1, b1, w2, b2)
    out = jax.block_until_ready(out)

    # Pure-JAX reference with the same tanh-approx GELU the kernel computes
    # (tanh approx drifts ~1e-3 relative from torch.nn.GELU()'s erf default).
    h = jnp.einsum("btc,ch->bth", x, w1) + b1
    g = 0.5 * h * (1.0 + jnp.tanh(_SQRT_2_OVER_PI * (h + 0.044715 * h ** 3)))
    ref = jnp.einsum("bth,hc->btc", g, w2) + b2
    assert jnp.allclose(out, ref, atol=5e-4, rtol=5e-4), "mismatch vs reference"

    print("KERNEL_OK")
</pallas_src>

<mosaic_0001>
module attributes {stable_mosaic.version = 11 : i64} {
  func.func @_mlp_kernel_resident(%arg0: i32, %arg1: memref<8x32xf32, #tpu.memory_space<vmem>>, %arg2: memref<32x128xf32, #tpu.memory_space<vmem>>, %arg3: memref<1x128xf32, #tpu.memory_space<vmem>>, %arg4: memref<128x32xf32, #tpu.memory_space<vmem>>, %arg5: memref<1x32xf32, #tpu.memory_space<vmem>>, %arg6: memref<8x32xf32, #tpu.memory_space<vmem>>) attributes {dimension_semantics = [#tpu.dimension_semantics<parallel>], iteration_bounds = array<i64: 2>, scalar_prefetch = 0 : i64, scratch_operands = 0 : i64, tpu.core_type = #tpu.core_type<tc>, window_params = [{transform_indices = @transform_0, window_bounds = array<i64: 8, 32>}, {pipeline_mode = #tpu.pipeline_mode<synchronous>, transform_indices = @transform_1, window_bounds = array<i64: 32, 128>}, {pipeline_mode = #tpu.pipeline_mode<synchronous>, transform_indices = @transform_2, window_bounds = array<i64: 1, 128>}, {pipeline_mode = #tpu.pipeline_mode<synchronous>, transform_indices = @transform_3, window_bounds = array<i64: 128, 32>}, {pipeline_mode = #tpu.pipeline_mode<synchronous>, transform_indices = @transform_4, window_bounds = array<i64: 1, 32>}, {transform_indices = @transform_5, window_bounds = array<i64: 8, 32>}]} {
    %c0 = arith.constant 0 : index
    %c0_0 = arith.constant 0 : index
    %0 = vector.load %arg1[%c0, %c0_0] : memref<8x32xf32, #tpu.memory_space<vmem>>, vector<8x32xf32>
    %c0_1 = arith.constant 0 : index
    %c0_2 = arith.constant 0 : index
    %1 = vector.load %arg2[%c0_1, %c0_2] : memref<32x128xf32, #tpu.memory_space<vmem>>, vector<32x128xf32>
    %cst = arith.constant dense<0.000000e+00> : vector<8x128xf32>
    %2 = tpu.matmul %0, %1, %cst {dimension_numbers = #tpu.dot_dimension_numbers<[1], [0], [0], [1], [0, 0, 1, 1], [], []>} : vector<8x32xf32>, vector<32x128xf32>, vector<8x128xf32> -> vector<8x128xf32>
    %c0_3 = arith.constant 0 : index
    %c0_4 = arith.constant 0 : index
    %3 = vector.load %arg3[%c0_3, %c0_4] : memref<1x128xf32, #tpu.memory_space<vmem>>, vector<1x128xf32>
    %4 = vector.broadcast %3 : vector<1x128xf32> to vector<8x128xf32>
    %5 = arith.addf %2, %4 : vector<8x128xf32>
    %6 = arith.mulf %5, %5 : vector<8x128xf32>
    %7 = arith.mulf %6, %5 : vector<8x128xf32>
    %cst_5 = arith.constant 4.471500e-02 : f32
    %8 = vector.broadcast %cst_5 : f32 to vector<8x128xf32>
    %9 = arith.mulf %8, %7 : vector<8x128xf32>
    %10 = arith.addf %5, %9 : vector<8x128xf32>
    %cst_6 = arith.constant 0.797884583 : f32
    %11 = vector.broadcast %cst_6 : f32 to vector<8x128xf32>
    %12 = arith.mulf %11, %10 : vector<8x128xf32>
    %cst_7 = arith.constant 5.000000e-01 : f32
    %13 = vector.broadcast %cst_7 : f32 to vector<8x128xf32>
    %14 = arith.mulf %13, %5 : vector<8x128xf32>
    %15 = math.tanh %12 : vector<8x128xf32>
    %cst_8 = arith.constant 1.000000e+00 : f32
    %16 = vector.broadcast %cst_8 : f32 to vector<8x128xf32>
    %17 = arith.addf %16, %15 : vector<8x128xf32>
    %18 = arith.mulf %14, %17 : vector<8x128xf32>
    %c0_9 = arith.constant 0 : index
    %c0_10 = arith.constant 0 : index
    %19 = vector.load %arg4[%c0_9, %c0_10] : memref<128x32xf32, #tpu.memory_space<vmem>>, vector<128x32xf32>
    %cst_11 = arith.constant dense<0.000000e+00> : vector<8x32xf32>
    %20 = tpu.matmul %18, %19, %cst_11 {dimension_numbers = #tpu.dot_dimension_numbers<[1], [0], [0], [1], [0, 0, 1, 1], [], []>} : vector<8x128xf32>, vector<128x32xf32>, vector<8x32xf32> -> vector<8x32xf32>
    %c0_12 = arith.constant 0 : index
    %c0_13 = arith.constant 0 : index
    %21 = vector.load %arg5[%c0_12, %c0_13] : memref<1x32xf32, #tpu.memory_space<vmem>>, vector<1x32xf32>
    %22 = vector.broadcast %21 : vector<1x32xf32> to vector<8x32xf32>
    %23 = arith.addf %20, %22 : vector<8x32xf32>
    %c0_14 = arith.constant 0 : index
    %c0_15 = arith.constant 0 : index
    %24 = vector.load %arg6[%c0_14, %c0_15] : memref<8x32xf32, #tpu.memory_space<vmem>>, vector<8x32xf32>
    tpu.vector_store %arg6[%c0_14, %c0_15], %23 {strides = array<i32>} : memref<8x32xf32, #tpu.memory_space<vmem>>, vector<8x32xf32>,
    return
  }
  func.func @transform_0(%arg0: i32) -> (i32, i32) {
    %c0_i32 = arith.constant 0 : i32
    %c0_i32_0 = arith.constant 0 : i32
    return %arg0, %c0_i32 : i32, i32
  }
  func.func @transform_1(%arg0: i32) -> (i32, i32) {
    %c0_i32 = arith.constant 0 : i32
    %c0_i32_0 = arith.constant 0 : i32
    %c0_i32_1 = arith.constant 0 : i32
    return %c0_i32, %c0_i32_0 : i32, i32
  }
  func.func @transform_2(%arg0: i32) -> (i32, i32) {
    %c0_i32 = arith.constant 0 : i32
    %c0_i32_0 = arith.constant 0 : i32
    %c0_i32_1 = arith.constant 0 : i32
    return %c0_i32, %c0_i32_0 : i32, i32
  }
  func.func @transform_3(%arg0: i32) -> (i32, i32) {
    %c0_i32 = arith.constant 0 : i32
    %c0_i32_0 = arith.constant 0 : i32
    %c0_i32_1 = arith.constant 0 : i32
    return %c0_i32, %c0_i32_0 : i32, i32
  }
  func.func @transform_4(%arg0: i32) -> (i32, i32) {
    %c0_i32 = arith.constant 0 : i32
    %c0_i32_0 = arith.constant 0 : i32
    %c0_i32_1 = arith.constant 0 : i32
    return %c0_i32, %c0_i32_0 : i32, i32
  }
  func.func @transform_5(%arg0: i32) -> (i32, i32) {
    %c0_i32 = arith.constant 0 : i32
    %c0_i32_0 = arith.constant 0 : i32
    return %arg0, %c0_i32 : i32, i32
  }
}

</mosaic_0001>

<bundles_post_ra>
// kernel: tpu_custom_call.1
= control target key start
LH: loop header
LB: loop body
LE: loop exit
PB: predicated region body
PF: predicated region fallthrough
CT: control target
= control target key end

     0   :  { %10 = vsyncpa [#allocation3], 0  ;;  %s884_s0 = inlined_call_operand.vmem [shape: f32[16,32], index: 0, kind: input, shape index: {}]   ;;  %s885_s1 = inlined_call_operand.vmem [shape: f32[32,128], index: 1, kind: input, shape index: {}]   ;;  %s886_s2 = inlined_call_operand.vmem [shape: f32[1,128], index: 2, kind: input, shape index: {}]   ;;  %s887_s3 = inlined_call_operand.vmem [shape: f32[128,32], index: 3, kind: input, shape index: {}]   ;;  %s888_s4 = inlined_call_operand.vmem [shape: f32[1,32], index: 4, kind: input, shape index: {}]   ;;  %s889_s5 = inlined_call_operand.hbm [shape: f32[16,32], index: 5, kind: output, shape index: {}]  }
   0x1   :  { %12 = vsyncpa [#allocation3 + $0x1], 0  ;;  %s701_s18 = smov 0   ;;  %s703_s19 = smov 0  }
   0x2   :  { %s705_s20 = smov 0   ;;  %s707_s21 = smov 0  }
   0x3 LB: > { %s722_s22 = sadd.s32 4294967295, %s666_s21   ;;  %s482_s23 = sadd.s32 4294967294, %s666_s21   ;;  %s666_s21 = sphi %s707_s21, %s895_s21   ;;  %s662_s20 = sphi %s705_s20, %s894_s20   ;;  %s658_s19 = sphi %s703_s19, %s893_s19   ;;  %s654_s18 = sphi %s701_s18, %s892_s18  }
   0x4   : > { %s726_s24 = sadd.s32 1, %s666_s21   ;;  %s135_s25 = sadd.s32 1, %s662_s20 }
   0x5   : > { %s132_s26 = ssub.s32 %s666_s21, %s726_s24  ;;  %p145_p0 = scmp.ne.s32.totalorder %s662_s20, %s658_s19 }
   0x6   : > { %p133_p1 = scmp.eq.s32.totalorder %s132_s26, 0  ;;  %p146_p2 = scmp.eq.s32.totalorder %s722_s22, 1 }
   0x7   : > { %p151_p3 = scmp.ne.s32.totalorder %s658_s19, %s654_s18  ;;  %p152_p4 = scmp.eq.s32.totalorder %s482_s23, 1 }
   0x8   : > { %s737_s27 = scalar_select %p133_p1, %s662_s20, %s135_s25  }
   0x9   : > { %p739_p5 = por %p146_p2, %p145_p0  ;;  %p743_p6 = por %p152_p4, %p151_p3 }
   0xa   : > { %p485_p7 = scmp.ge.s32.totalorder %s666_s21, 1  ;;  %p189_p8 = scmp.lt.s32.totalorder %s666_s21, 3 }
   0xc   : > { %p190_p9 = pnand %p485_p7, %p189_p8 }
   0xd   : > { %p216_p10 = scmp.lt.s32.totalorder (!%p190_p9), %s722_s22, 1  ;;  %s213_s26 = sand.u32 (!%p190_p9), 1, %s658_s19  }
   0xe   : > { %193 = sbr.rel (%p190_p9) target bundleno = 459 (0x1cb), region = 40  ;;  %s486_s30 = sshll.u32 (!%p190_p9), %s213_s26, 3 }
   0xf   : > { %s492_s8 = sshll.u32 (!%p190_p9), %s722_s22, 7  ;;  %s410_s14 = scalar_lea.sflag (!%p190_p9), [#allocation3], %s213_s26 }
  0x10   : > { %s848_s13 = scalar_lea.hbm (!%p190_p9), %s889_s5, %s492_s8 }
  0x13   : > { %v224_v0 = vld [vmem:[%s885_s1 + $0x18] sm:$0xff]  ;;  %v668_v1 = vmov 0.0   ;;  %v223_v2 = vld [vmem:[%s885_s1 + $0x10] sm:$0xff]  ;;  %vm669_vm0 = vmmov 0   ;;  %s217_s9 = scalar_select %p216_p10, %s722_s22, 1  ;;  %v222_v3 = vld [vmem:[%s885_s1 + $0x8] sm:$0xff] }
  0x14   : > { %517 = vmatprep.subr.mxu0 %v668_v1  ;;  %525 = vmatprep.mubr.msk.f32.mxu0 %vm669_vm0, %v668_v1  ;;  %v221_v4 = vld [vmem:[%s885_s1] sm:$0xff]  ;;  %vm232_vm1 = vcmask 261120   ;;  %v330_v6 = vld [vmem:[%s887_s3 + $0x78] sm:$0xff]  ;;  %v329_v7 = vld [vmem:[%s887_s3 + $0x70] sm:$0xff]  ;;  %s670_s22 = smov [#allocation2]  }
  0x15   : > { %518 = vmatpush3.msra.mxu0 %v224_v0  ;;  %528 = vmatprep.subr.mxu1 %v668_v1  ;;  %s487_s12 = sshll.u32 %s217_s9, 3  ;;  %v328_v8 = vld [vmem:[%s887_s3 + $0x68] sm:$0xff]  ;;  %v327_v9 = vld [vmem:[%s887_s3 + $0x60] sm:$0xff]  ;;  %v326_v10 = vld [vmem:[%s887_s3 + $0x58] sm:$0xff]  ;;  %s215_s9 = scalar_lea.vmem [#allocation2], %s486_s30 }
  0x16   : > { %519 = vmatprep.subr.mxu0 %v668_v1  ;;  %560 = vmatprep.mubr.msk.f32.mxu1 %vm669_vm0, %v668_v1  ;;  %s219_s17 = scalar_lea.vmem %s884_s0, %s487_s12  ;;  %v325_v11 = vld [vmem:[%s887_s3 + $0x50] sm:$0xff]  ;;  %v324_v12 = vld [vmem:[%s887_s3 + $0x48] sm:$0xff]  ;;  %v323_v13 = vld [vmem:[%s887_s3 + $0x40] sm:$0xff]  ;;  %s423_s10 = sshll.u32 %s215_s9, 4  ;;  %s424_s10 = int_to_ptr.vmem [resolvable:$true] %s423_s10 }
  0x17   : > { %520 = vmatpush3.msra.mxu0 %v223_v2  ;;  %v220_v5 = vld [vmem:[%s219_s17] sm:$0xff]  ;;  %529 = vmatpush3.msra.mxu1 %v330_v6  ;;  %v322_v14 = vld [vmem:[%s887_s3 + $0x38] sm:$0xff]  ;;  %v321_v15 = vld [vmem:[%s887_s3 + $0x30] sm:$0xff]  ;;  %s606_s15 = scalar_lea.vmem %s424_s10, 128  ;;  %s610_s16 = sshll.u32 %s670_s22, 4  ;;  %s611_s16 = int_to_ptr.vmem [resolvable:$false] %s610_s16 }
  0x18   : > { %521 = vmatprep.subr.mxu0 %v668_v1  ;;  %530 = vmatprep.subr.mxu1 %v668_v1  ;;  %v320_v16 = vld [vmem:[%s887_s3 + $0x28] sm:$0xff]  ;;  %v319_v17 = vld [vmem:[%s887_s3 + $0x20] sm:$0xff]  ;;  %v318_v18 = vld [vmem:[%s887_s3 + $0x18] sm:$0xff]  ;;  %p607_p11 = scmp.ne.s32.totalorder %s424_s10, %s606_s15  ;;  %s612_s17 = scalar_lea.vmem %s611_s16, 256 }
  0x19   : > { %522 = vmatpush3.msra.mxu0 %v222_v3  ;;  %531 = vmatpush3.msra.mxu1 %v329_v7  ;;  %v317_v19 = vld [vmem:[%s887_s3 + $0x10] sm:$0xff]  ;;  %v316_v20 = vld [vmem:[%s887_s3 + $0x8] sm:$0xff]  ;;  %v315_v21 = vld [vmem:[%s887_s3] sm:$0xff]  ;;  %p613_p0 = scmp.lt.s32.totalorder %s424_s10, %s611_s16  ;;  %p614_p1 = scmp.lt.s32.totalorder %s612_s17, %s606_s15 }
  0x1a   : > { %523 = vmatprep.subr.mxu0 %v668_v1  ;;  %532 = vmatprep.subr.mxu1 %v668_v1  ;;  %v488_v22 = vld [vmem:[%s886_s2] ss:$0 sm:$0xff]  ;;  %p608_p12 = pnand %p607_p11, %p739_p5 }
  0x1b   : > { %524 = vmatpush3.msra.mxu0 %v221_v4  ;;  %533 = vmatpush3.msra.mxu1 %v328_v8  ;;  %v490_v35 = vld [vmem:[%s888_s4] ss:$0 sm:$0xff]  ;;  %p615_p2 = por %p614_p1, %p613_p0 }
  0x1c   : > { %526 = vmatmul.mubr.msk.f32.vlgmr.msra.gmra.mxu0 %vm232_vm1, %v220_v5  ;;  %534 = vmatprep.subr.mxu1 %v668_v1  ;;  %p609_p13 = pneg %p608_p12 }
  0x1d   : > { %535 = vmatpush3.msra.mxu1 %v327_v9 }
  0x1e   : > { %536 = vmatprep.subr.mxu1 %v668_v1  ;;  %p616_p3 = pnand %p615_p2, %p609_p13 }
  0x1f   : > { %537 = vmatpush3.msra.mxu1 %v326_v10 }
  0x20   : > { %538 = vmatprep.subr.mxu1 %v668_v1 }
  0x21   : > { %539 = vmatpush3.msra.mxu1 %v325_v11 }
  0x22   : > { %540 = vmatprep.subr.mxu1 %v668_v1 }
  0x23   : > { %541 = vmatpush3.msra.mxu1 %v324_v12 }
  0x24   : > { %542 = vmatprep.subr.mxu1 %v668_v1 }
  0x25   : > { %543 = vmatpush3.msra.mxu1 %v323_v13 }
  0x26   : > { %544 = vmatprep.subr.mxu1 %v668_v1 }
  0x27   : > { %545 = vmatpush3.msra.mxu1 %v322_v14 }
  0x28   : > { %546 = vmatprep.subr.mxu1 %v668_v1 }
  0x29   : > { %547 = vmatpush3.msra.mxu1 %v321_v15 }
  0x2a   : > { %548 = vmatprep.subr.mxu1 %v668_v1 }
  0x2b   : > { %549 = vmatpush3.msra.mxu1 %v320_v16 }
  0x2c   : > { %550 = vmatprep.subr.mxu1 %v668_v1 }
  0x2d   : > { %551 = vmatpush3.msra.mxu1 %v319_v17 }
  0x2e   : > { %552 = vmatprep.subr.mxu1 %v668_v1 }
  0x2f   : > { %553 = vmatpush3.msra.mxu1 %v318_v18 }
  0x30   : > { %554 = vmatprep.subr.mxu1 %v668_v1 }
  0x31   : > { %555 = vmatpush3.msra.mxu1 %v317_v19 }
  0x32   : > { %556 = vmatprep.subr.mxu1 %v668_v1 }
  0x33   : > { %557 = vmatpush3.msra.mxu1 %v316_v20 }
  0x34   : > { %558 = vmatprep.subr.mxu1 %v668_v1 }
  0x35   : > { %559 = vmatpush3.msra.mxu1 %v315_v21 }
  0xdc   : > { %v302_v23 = vpop.f32.mrf.mxu0 }
  0xdd   : > { %v303_v24 = vadd.f32 %v488_v22, %v302_v23 }
  0xde   : > { %v527_v25 = vpop.f32.mrf.mxu0 }
  0xdf   : > { %v306_v26 = vmul.f32 %v303_v24, %v303_v24  ;;  %v311_v32 = vmul.f32 0.5, %v303_v24 }
  0xe1   : > { %v307_v27 = vmul.f32 %v306_v26, %v303_v24 }
  0xe3   : > { %v308_v28 = vmul.f32 0.044715, %v307_v27 }
  0xe5   : > { %v309_v29 = vadd.f32 %v308_v28, %v303_v24 }
  0xe7   : > { %v310_v30 = vmul.f32 0.7978846, %v309_v29 }
  0xe9   : > { %604 = vtanh.f32 %v310_v30 }
  0xf6   : > { %v605_v31 = vpop.eup %604 }
  0xf7   : > { %v313_v33 = vadd.f32 1.0, %v605_v31 }
  0xf9   : > { %v314_v34 = vmul.f32 %v313_v33, %v311_v32 }
  0xfb   : > { %561 = vmatmul.mubr.f32.vlgmr.msra.gmra.mxu1 %v314_v34 }
 0x1bb   : > { %v404_v36 = vpop.f32.mrf.mxu1 }
 0x1bc   : > { %v405_v37 = vadd.f32 %v490_v35, %v404_v36 }
 0x1bd   : > { %v562_v38 = vpop.f32.mrf.mxu1 }
 0x1be   : > { %408 = vst.msk [vmem:[%s215_s9] sm:$0xff] %vm232_vm1, %v405_v37 }
 0x1bf   : > { %619 = shalt.err (!%p616_p3)
}
 0x1c0   : > { %s620_s23 = scalar_lea.hbm %s848_s13, 128  ;;  %s624_s30 = scalar_lea.hbm %s889_s5, 256 }
 0x1c1   : > { %p621_p4 = scmp.ne.s32.totalorder %s848_s13, %s620_s23  ;;  %p625_p9 = scmp.lt.s32.totalorder %s848_s13, %s889_s5 }
 0x1c2   : > { %p626_p10 = scmp.lt.s32.totalorder %s624_s30, %s620_s23 }
 0x1c3   : > { %p622_p7 = pnand %p621_p4, %p739_p5 }
 0x1c4   : > { %p627_p11 = por %p626_p10, %p625_p9 }
 0x1c5   : > { %p623_p8 = pneg %p622_p7 }
 0x1c7   : > { %p628_p12 = pnand %p627_p11, %p623_p8 }
 0x1c9   : > { %631 = shalt.err (!%p628_p12)
}
 0x1ca   : > { %563 = dma.vmem_to_hbm [thread:$0]  (%p739_p5), %s424_s10, 128, %s848_s13, %s410_s14  }
 0x1cb PF: > { %p569_p13 = scmp.ge.s32.totalorder %s666_s21, 2  ;;  %s435_s8 = sand.u32 1, %s654_s18  }
 0x1cc   : > { %s436_s9 = scalar_lea.sflag [#allocation3], %s435_s8 }
 0x1cd   : > { %p566_p0 = pnand %p569_p13, %p743_p6 }
 0x1cf   : > { %p567_p1 = pneg %p566_p0 }
 0x1d1   : > { %649 = dma.done.wait (%p567_p1), %s436_s9, 128  }
 0x1d2   : > { %651 = vsyncadd (%p567_p1), %s436_s9, 4294967168  ;;  %p15_p2 = scmp.ge.s32.totalorder %s726_s24, 4   ;;  %s892_s18 = smov %s658_s19 }
 0x1d3   : > { %s893_s19 = smov %s662_s20  ;;  %s894_s20 = smov %s737_s27 }
 0x1d4   : > { %s895_s21 = smov %s726_s24  ;;  %17 = sbr.rel (!%p15_p2) target bundleno = 3 (0x3), region = 75 }
 0x1d9   :  { %441 = vsyncpa [#allocation3], 1 }
 0x1da   :  { %443 = vsyncpa [#allocation3 + $0x1], 1 }

</bundles_post_ra>
